<compile_context>
chip_gen: v7x
topology: tpu7x:2x2x1
jax: 0.10.0
libtpu: 0.0.40
codegen_flags: <defaults>
</compile_context>

<pallas_src>
import functools

import numpy as np
import jax
import jax.numpy as jnp
from jax.experimental import pallas as pl
from jax.experimental.pallas import tpu as pltpu


def _round_up(x, m):
    return (x + m - 1) // m * m


# ----------------------------------------------------------------------------
# Kernel body: one (batch element, query block) per grid step, all in VMEM.
# ----------------------------------------------------------------------------
def _attention_body(q_ref, k_ref, v_ref, wq_ref, wk_ref, wv_ref, o_ref, mask_ref,
                    *, scale, seq_len, pad_keys):
    f32 = jnp.float32
    bf16 = jnp.bfloat16

    # Projections: bf16 x bf16 on the MXU, f32 accumulation.
    q = jnp.dot(q_ref[...], wq_ref[...], preferred_element_type=f32)
    k = jnp.dot(k_ref[...], wk_ref[...], preferred_element_type=f32)
    v = jnp.dot(v_ref[...], wv_ref[...], preferred_element_type=f32)

    # Fold 1/sqrt(d_key) into q: O(tq*d_key) VPU multiplies instead of O(tq*T).
    q = q * scale

    # Scores: contract over the feature axis (no explicit key transpose);
    # bf16 MXU operands, f32 accumulation.
    s = jnp.einsum("qd,kd->qk", q.astype(bf16), k.astype(bf16),
                   preferred_element_type=f32)

    neg_inf = f32(-jnp.inf)
    if mask_ref is not None:
        # torch masked_fill(mask == 0, -inf); padded key columns arrive False.
        s = jnp.where(mask_ref[...], s, neg_inf)
    elif pad_keys:
        # In-kernel key-padding mask: no HBM mask traffic at all.
        kidx = jax.lax.broadcasted_iota(jnp.int32, s.shape, 1)
        s = jnp.where(kidx < seq_len, s, neg_inf)

    # Numerically stable row softmax; elementwise math kept in f32.
    m = jnp.max(s, axis=-1, keepdims=True)
    p = jnp.exp(s - m)
    attn = p * pl.reciprocal(jnp.sum(p, axis=-1, keepdims=True), approx=True)

    # Context: bf16 MXU operands, f32 accumulation, lane-dense f32 store.
    o_ref[...] = jnp.dot(attn.astype(bf16), v.astype(bf16),
                         preferred_element_type=f32).astype(o_ref.dtype)


def _kernel_masked(q_ref, k_ref, v_ref, wq_ref, wk_ref, wv_ref, mask_ref, o_ref, **kw):
    _attention_body(q_ref, k_ref, v_ref, wq_ref, wk_ref, wv_ref, o_ref, mask_ref, **kw)


def _kernel_unmasked(q_ref, k_ref, v_ref, wq_ref, wk_ref, wv_ref, o_ref, **kw):
    _attention_body(q_ref, k_ref, v_ref, wq_ref, wk_ref, wv_ref, o_ref, None, **kw)


def _vmem_limit_bytes(tq, Tp, Dm_p, Dk_p, has_mask):
    """Scoped-VMEM request derived from the pipeline-buffer arithmetic (+ headroom)."""
    bf16, f32 = 2, 4
    # Double-buffered pipeline blocks: q / k / v inputs and the f32 output block,
    # plus the grid-invariant weights (auto-pipeliner still allocates 2 buffers)
    # and the optional bool mask block.
    blocks = 2 * (tq * Dm_p * bf16 + 2 * Tp * Dm_p * bf16 + tq * Dk_p * f32)
    blocks += 2 * 3 * Dm_p * Dk_p * bf16
    if has_mask:
        blocks += 2 * tq * Tp  # bool = 1 byte
    # Live in-kernel intermediates: f32 projections, scores/probs, bf16 MXU copies.
    inter = f32 * (tq * Dk_p + 2 * Tp * Dk_p + 3 * tq * Tp)
    inter += bf16 * (2 * tq * Tp + tq * Dk_p + 2 * Tp * Dk_p)
    est = int(1.5 * (blocks + inter)) + (1 << 20)
    return max(32 << 20, min(64 << 20, est))


# ----------------------------------------------------------------------------
# Wrapper: host-side padding to (8, 128) tiles + pallas_call plumbing.
# ----------------------------------------------------------------------------
def attention_head_forward(queries, keys, values, wq, wk, wv, mask=None,
                           *, q_block_max=256):
    """Returns (result, None, None), matching AttentionHead.forward defaults."""
    B, T, d_model = queries.shape
    d_key = wq.shape[0]
    scale = 1.0 / float(np.sqrt(d_key))

    Tp8 = _round_up(T, 8)                 # sublane-aligned sequence length
    tq = min(q_block_max, Tp8)            # query tile (caps intermediates at O(tq*T))
    Tp = _round_up(Tp8, tq)               # padded sequence, exact multiple of tq
    Dm_p = _round_up(d_model, 128)        # lane-aligned model dim
    Dk_p = _round_up(d_key, 128)          # lane-aligned key dim (lane-dense output)
    num_q_blocks = Tp // tq

    def pad_seq(x):                       # (B, T, d_model) -> bf16 (B, Tp, Dm_p)
        return jnp.pad(x, ((0, 0), (0, Tp - T), (0, Dm_p - d_model))
                       ).astype(jnp.bfloat16)

    qp, kp, vp = pad_seq(queries), pad_seq(keys), pad_seq(values)

    def pad_w(w):                         # torch (d_key, d_model) -> bf16 (Dm_p, Dk_p)
        return jnp.pad(w.T, ((0, Dm_p - d_model), (0, Dk_p - d_key))
                       ).astype(jnp.bfloat16)

    wq_p, wk_p, wv_p = pad_w(wq), pad_w(wk), pad_w(wv)

    has_mask = mask is not None
    pad_keys = (Tp > T) and not has_mask   # key-padding handled in-kernel via iota

    in_specs = [
        pl.BlockSpec((None, tq, Dm_p), lambda b, qi: (b, qi, 0)),   # queries (tiled)
        pl.BlockSpec((None, Tp, Dm_p), lambda b, qi: (b, 0, 0)),    # keys   (full seq)
        pl.BlockSpec((None, Tp, Dm_p), lambda b, qi: (b, 0, 0)),    # values (full seq)
        pl.BlockSpec((Dm_p, Dk_p), lambda b, qi: (0, 0)),           # Wq (grid-invariant)
        pl.BlockSpec((Dm_p, Dk_p), lambda b, qi: (0, 0)),           # Wk
        pl.BlockSpec((Dm_p, Dk_p), lambda b, qi: (0, 0)),           # Wv
    ]
    operands = [qp, kp, vp, wq_p, wk_p, wv_p]

    if has_mask:
        # Pass the user mask as bool, un-broadcast over batch when it is shared;
        # padded rows/columns are False (padded keys masked, padded q rows sliced off).
        mask_arr = jnp.asarray(mask) != 0
        if mask_arr.ndim == 2:
            mask_arr = mask_arr[None]
        if mask_arr.ndim != 3:
            raise ValueError("mask must broadcast to (B, T, T)")
        Bm = 1 if mask_arr.shape[0] == 1 else B
        mask_arr = jnp.broadcast_to(mask_arr, (Bm, T, T))
        mask_p = jnp.pad(mask_arr, ((0, 0), (0, Tp - T), (0, Tp - T)))
        if Bm == 1:
            mask_idx = lambda b, qi: (0, qi, 0)
        else:
            mask_idx = lambda b, qi: (b, qi, 0)
        in_specs.append(pl.BlockSpec((None, tq, Tp), mask_idx))
        operands.append(mask_p)
        kernel_fn = _kernel_masked
    else:
        kernel_fn = _kernel_unmasked        # no mask ref, no DMA, no select pass

    kernel = functools.partial(kernel_fn, scale=scale, seq_len=T, pad_keys=pad_keys)

    out_padded = pl.pallas_call(
        kernel,
        out_shape=jax.ShapeDtypeStruct((B, Tp, Dk_p), jnp.float32),
        grid=(B, num_q_blocks),
        in_specs=in_specs,
        out_specs=pl.BlockSpec((None, tq, Dk_p), lambda b, qi: (b, qi, 0)),
        compiler_params=pltpu.CompilerParams(
            dimension_semantics=("parallel", "parallel"),
            vmem_limit_bytes=_vmem_limit_bytes(tq, Tp, Dm_p, Dk_p, has_mask)),
    )(*operands)

    result = out_padded[:, :T, :d_key]
    return result, None, None


# ----------------------------------------------------------------------------
# Pure-JAX reference (mirrors the torch forward, f32 HIGHEST precision).
# ----------------------------------------------------------------------------
def reference_forward(queries, keys, values, wq, wk, wv, mask=None):
    hp = jax.lax.Precision.HIGHEST
    q = jnp.einsum("btm,km->btk", queries, wq, precision=hp)
    k = jnp.einsum("btm,km->btk", keys, wk, precision=hp)
    v = jnp.einsum("btm,km->btk", values, wv, precision=hp)
    attn = jnp.einsum("bqk,bsk->bqs", q, k, precision=hp) / float(np.sqrt(wq.shape[0]))
    if mask is not None:
        attn = jnp.where(mask == 0, -jnp.inf, attn)
    attn = jax.nn.softmax(attn, axis=-1)
    return jnp.einsum("bqs,bsk->bqk", attn, v, precision=hp)


def _run_case(key, B, T, d_model, d_key, use_mask):
    kq, kk_, kv, k1, k2, k3 = jax.random.split(key, 6)
    queries = jax.random.normal(kq, (B, T, d_model), jnp.float32)
    keys_in = jax.random.normal(kk_, (B, T, d_model), jnp.float32)
    values = jax.random.normal(kv, (B, T, d_model), jnp.float32)

    bound = 1.0 / float(np.sqrt(d_model))  # torch nn.Linear default init range
    wq = jax.random.uniform(k1, (d_key, d_model), jnp.float32, -bound, bound)
    wk = jax.random.uniform(k2, (d_key, d_model), jnp.float32, -bound, bound)
    wv = jax.random.uniform(k3, (d_key, d_model), jnp.float32, -bound, bound)

    mask = jnp.tril(jnp.ones((T, T), jnp.float32)) if use_mask else None

    out, _, _ = attention_head_forward(queries, keys_in, values, wq, wk, wv, mask=mask)
    out = jax.block_until_ready(out)
    ref = reference_forward(queries, keys_in, values, wq, wk, wv, mask=mask)
    assert out.shape == (B, T, d_key)
    # bf16 MXU operands + approx reciprocal -> compare at bf16-appropriate tolerance.
    np.testing.assert_allclose(np.asarray(out), np.asarray(ref), rtol=2e-2, atol=2e-2)


if __name__ == "__main__":
    root = jax.random.PRNGKey(0)
    c1, c2, c3 = jax.random.split(root, 3)

    # Unmasked path (module default), aligned shapes.
    _run_case(c1, B=2, T=8, d_model=32, d_key=32, use_mask=False)
    # Masked path (causal mask shared across batch, exercises masked_fill(== 0, -inf)).
    _run_case(c2, B=2, T=8, d_model=32, d_key=32, use_mask=True)
    # Unaligned shapes: exercises the in-kernel iota key-padding mask + feature padding.
    _run_case(c3, B=3, T=6, d_model=20, d_key=12, use_mask=False)

    print("KERNEL_OK")
</pallas_src>

<mosaic_0001>
module attributes {stable_mosaic.version = 11 : i64} {
  func.func @_kernel_unmasked(%arg0: i32, %arg1: i32, %arg2: memref<1x8x128xbf16, #tpu.memory_space<vmem>>, %arg3: memref<1x8x128xbf16, #tpu.memory_space<vmem>>, %arg4: memref<1x8x128xbf16, #tpu.memory_space<vmem>>, %arg5: memref<128x128xbf16, #tpu.memory_space<vmem>>, %arg6: memref<128x128xbf16, #tpu.memory_space<vmem>>, %arg7: memref<128x128xbf16, #tpu.memory_space<vmem>>, %arg8: memref<1x8x128xf32, #tpu.memory_space<vmem>>) attributes {dimension_semantics = [#tpu.dimension_semantics<parallel>, #tpu.dimension_semantics<parallel>], iteration_bounds = array<i64: 2, 1>, scalar_prefetch = 0 : i64, scratch_operands = 0 : i64, tpu.core_type = #tpu.core_type<tc>, window_params = [{transform_indices = @transform_0, window_bounds = array<i64: 1, 8, 128>}, {transform_indices = @transform_1, window_bounds = array<i64: 1, 8, 128>}, {transform_indices = @transform_2, window_bounds = array<i64: 1, 8, 128>}, {pipeline_mode = #tpu.pipeline_mode<synchronous>, transform_indices = @transform_3, window_bounds = array<i64: 128, 128>}, {pipeline_mode = #tpu.pipeline_mode<synchronous>, transform_indices = @transform_4, window_bounds = array<i64: 128, 128>}, {pipeline_mode = #tpu.pipeline_mode<synchronous>, transform_indices = @transform_5, window_bounds = array<i64: 128, 128>}, {transform_indices = @transform_6, window_bounds = array<i64: 1, 8, 128>}]} {
    %c0 = arith.constant 0 : index
    %c0_0 = arith.constant 0 : index
    %c0_1 = arith.constant 0 : index
    %0 = vector.load %arg2[%c0, %c0_0, %c0_1] : memref<1x8x128xbf16, #tpu.memory_space<vmem>>, vector<1x8x128xbf16>
    %1 = vector.shape_cast %0 : vector<1x8x128xbf16> to vector<8x128xbf16>
    %c0_2 = arith.constant 0 : index
    %c0_3 = arith.constant 0 : index
    %2 = vector.load %arg5[%c0_2, %c0_3] : memref<128x128xbf16, #tpu.memory_space<vmem>>, vector<128x128xbf16>
    %cst = arith.constant dense<0.000000e+00> : vector<8x128xf32>
    %3 = tpu.matmul %1, %2, %cst {dimension_numbers = #tpu.dot_dimension_numbers<[1], [0], [0], [1], [0, 0, 1, 1], [], []>} : vector<8x128xbf16>, vector<128x128xbf16>, vector<8x128xf32> -> vector<8x128xf32>
    %c0_4 = arith.constant 0 : index
    %c0_5 = arith.constant 0 : index
    %c0_6 = arith.constant 0 : index
    %4 = vector.load %arg3[%c0_4, %c0_5, %c0_6] : memref<1x8x128xbf16, #tpu.memory_space<vmem>>, vector<1x8x128xbf16>
    %5 = vector.shape_cast %4 : vector<1x8x128xbf16> to vector<8x128xbf16>
    %c0_7 = arith.constant 0 : index
    %c0_8 = arith.constant 0 : index
    %6 = vector.load %arg6[%c0_7, %c0_8] : memref<128x128xbf16, #tpu.memory_space<vmem>>, vector<128x128xbf16>
    %cst_9 = arith.constant dense<0.000000e+00> : vector<8x128xf32>
    %7 = tpu.matmul %5, %6, %cst_9 {dimension_numbers = #tpu.dot_dimension_numbers<[1], [0], [0], [1], [0, 0, 1, 1], [], []>} : vector<8x128xbf16>, vector<128x128xbf16>, vector<8x128xf32> -> vector<8x128xf32>
    %c0_10 = arith.constant 0 : index
    %c0_11 = arith.constant 0 : index
    %c0_12 = arith.constant 0 : index
    %8 = vector.load %arg4[%c0_10, %c0_11, %c0_12] : memref<1x8x128xbf16, #tpu.memory_space<vmem>>, vector<1x8x128xbf16>
    %9 = vector.shape_cast %8 : vector<1x8x128xbf16> to vector<8x128xbf16>
    %c0_13 = arith.constant 0 : index
    %c0_14 = arith.constant 0 : index
    %10 = vector.load %arg7[%c0_13, %c0_14] : memref<128x128xbf16, #tpu.memory_space<vmem>>, vector<128x128xbf16>
    %cst_15 = arith.constant dense<0.000000e+00> : vector<8x128xf32>
    %11 = tpu.matmul %9, %10, %cst_15 {dimension_numbers = #tpu.dot_dimension_numbers<[1], [0], [0], [1], [0, 0, 1, 1], [], []>} : vector<8x128xbf16>, vector<128x128xbf16>, vector<8x128xf32> -> vector<8x128xf32>
    %cst_16 = arith.constant 0.176776692 : f32
    %12 = vector.broadcast %cst_16 : f32 to vector<8x128xf32>
    %13 = arith.mulf %3, %12 : vector<8x128xf32>
    %14 = arith.truncf %13 : vector<8x128xf32> to vector<8x128xbf16>
    %15 = arith.truncf %7 : vector<8x128xf32> to vector<8x128xbf16>
    "tpu.trace_start"() <{level = 10 : i32, message = "qd,kd->qk"}> : () -> ()
    %cst_17 = arith.constant dense<0.000000e+00> : vector<8x8xf32>
    %16 = tpu.matmul %14, %15, %cst_17 {dimension_numbers = #tpu.dot_dimension_numbers<[1], [1], [0], [0], [0, 0, 1, 0], [], []>} : vector<8x128xbf16>, vector<8x128xbf16>, vector<8x8xf32> -> vector<8x8xf32>
    "tpu.trace_stop"() : () -> ()
    %cst_18 = arith.constant dense<0xFF800000> : vector<8xf32>
    %17 = vector.multi_reduction <maximumf>, %16, %cst_18 [1] : vector<8x8xf32> to vector<8xf32>
    %18 = vector.shape_cast %17 : vector<8xf32> to vector<8x1xf32>
    %19 = vector.broadcast %18 : vector<8x1xf32> to vector<8x8xf32>
    %20 = arith.subf %16, %19 : vector<8x8xf32>
    %21 = math.exp %20 : vector<8x8xf32>
    %cst_19 = arith.constant dense<0.000000e+00> : vector<8xf32>
    %22 = vector.multi_reduction <add>, %21, %cst_19 [1] : vector<8x8xf32> to vector<8xf32>
    %23 = vector.shape_cast %22 : vector<8xf32> to vector<8x1xf32>
    %24 = tpu.reciprocal %23 {approx = true} : vector<8x1xf32> -> vector<8x1xf32>
    %25 = vector.broadcast %24 : vector<8x1xf32> to vector<8x8xf32>
    %26 = arith.mulf %21, %25 : vector<8x8xf32>
    %27 = arith.truncf %26 : vector<8x8xf32> to vector<8x8xbf16>
    %28 = arith.truncf %11 : vector<8x128xf32> to vector<8x128xbf16>
    %cst_20 = arith.constant dense<0.000000e+00> : vector<8x128xf32>
    %29 = tpu.matmul %27, %28, %cst_20 {dimension_numbers = #tpu.dot_dimension_numbers<[1], [0], [0], [1], [0, 0, 1, 1], [], []>} : vector<8x8xbf16>, vector<8x128xbf16>, vector<8x128xf32> -> vector<8x128xf32>
    %c0_21 = arith.constant 0 : index
    %c0_22 = arith.constant 0 : index
    %c0_23 = arith.constant 0 : index
    %30 = vector.load %arg8[%c0_21, %c0_22, %c0_23] : memref<1x8x128xf32, #tpu.memory_space<vmem>>, vector<1x8x128xf32>
    %31 = vector.shape_cast %30 : vector<1x8x128xf32> to vector<8x128xf32>
    %32 = vector.shape_cast %29 : vector<8x128xf32> to vector<1x8x128xf32>
    tpu.vector_store %arg8[%c0_21, %c0_22, %c0_23], %32 {strides = array<i32>} : memref<1x8x128xf32, #tpu.memory_space<vmem>>, vector<1x8x128xf32>,
    return
  }
  func.func @transform_0(%arg0: i32, %arg1: i32) -> (i32, i32, i32) {
    %c0_i32 = arith.constant 0 : i32
    %c0_i32_0 = arith.constant 0 : i32
    return %arg0, %arg1, %c0_i32 : i32, i32, i32
  }
  func.func @transform_1(%arg0: i32, %arg1: i32) -> (i32, i32, i32) {
    %c0_i32 = arith.constant 0 : i32
    %c0_i32_0 = arith.constant 0 : i32
    %c0_i32_1 = arith.constant 0 : i32
    return %arg0, %c0_i32, %c0_i32_0 : i32, i32, i32
  }
  func.func @transform_2(%arg0: i32, %arg1: i32) -> (i32, i32, i32) {
    %c0_i32 = arith.constant 0 : i32
    %c0_i32_0 = arith.constant 0 : i32
    %c0_i32_1 = arith.constant 0 : i32
    return %arg0, %c0_i32, %c0_i32_0 : i32, i32, i32
  }
  func.func @transform_3(%arg0: i32, %arg1: i32) -> (i32, i32) {
    %c0_i32 = arith.constant 0 : i32
    %c0_i32_0 = arith.constant 0 : i32
    %c0_i32_1 = arith.constant 0 : i32
    return %c0_i32, %c0_i32_0 : i32, i32
  }
  func.func @transform_4(%arg0: i32, %arg1: i32) -> (i32, i32) {
    %c0_i32 = arith.constant 0 : i32
    %c0_i32_0 = arith.constant 0 : i32
    %c0_i32_1 = arith.constant 0 : i32
    return %c0_i32, %c0_i32_0 : i32, i32
  }
  func.func @transform_5(%arg0: i32, %arg1: i32) -> (i32, i32) {
    %c0_i32 = arith.constant 0 : i32
    %c0_i32_0 = arith.constant 0 : i32
    %c0_i32_1 = arith.constant 0 : i32
    return %c0_i32, %c0_i32_0 : i32, i32
  }
  func.func @transform_6(%arg0: i32, %arg1: i32) -> (i32, i32, i32) {
    %c0_i32 = arith.constant 0 : i32
    %c0_i32_0 = arith.constant 0 : i32
    return %arg0, %arg1, %c0_i32 : i32, i32, i32
  }
}

</mosaic_0001>

<bundles_post_ra>
// kernel: tpu_custom_call.1
= control target key start
LH: loop header
LB: loop body
LE: loop exit
PB: predicated region body
PF: predicated region fallthrough
CT: control target
= control target key end

     0   :  { %s1976_s0 = inlined_call_operand.hbm [shape: bf16[2,8,128], index: 0, kind: input, shape index: {}]   ;;  %s1977_s1 = inlined_call_operand.hbm [shape: bf16[2,8,128], index: 1, kind: input, shape index: {}]   ;;  %s1978_s2 = inlined_call_operand.hbm [shape: bf16[2,8,128], index: 2, kind: input, shape index: {}]   ;;  %s1979_s3 = inlined_call_operand.hbm [shape: bf16[128,128], index: 3, kind: input, shape index: {}]   ;;  %s1980_s4 = inlined_call_operand.hbm [shape: bf16[128,128], index: 4, kind: input, shape index: {}]   ;;  %s1981_s5 = inlined_call_operand.hbm [shape: bf16[128,128], index: 5, kind: input, shape index: {}]   ;;  %s1982_s6 = inlined_call_operand.hbm [shape: f32[2,8,128], index: 6, kind: output, shape index: {}]  }
   0x1   :  { %2009 = sst [smem:[#allocation26_spill]] %s1977_s1 }
   0x2   :  { %2010 = sst [smem:[#allocation27_spill]] %s1979_s3 }
   0x3   :  { %2011 = sst [smem:[#allocation28_spill]] %s1982_s6 }
   0x4   :  { %11 = vsyncpa [#allocation3], 0 }
   0x5   :  { %13 = vsyncpa [#allocation3 + $0x1], 0 }
   0x6   :  { %14 = vsyncpa [#allocation6], 0 }
   0x7   :  { %16 = vsyncpa [#allocation6 + $0x1], 0 }
   0x8   :  { %17 = vsyncpa [#allocation9], 0 }
   0x9   :  { %18 = vsyncpa [#allocation12], 0 }
   0xa   :  { %19 = vsyncpa [#allocation4], 0 }
   0xb   :  { %21 = vsyncpa [#allocation4 + $0x1], 0  ;;  %s1591_s21 = smov 0   ;;  %s1593_s22 = smov 0  }
   0xc   :  { %s1595_s23 = smov 0   ;;  %s1597_s24 = smov 0  }
   0xd   :  { %s1599_s25 = smov 0   ;;  %s1601_s26 = smov 0  }
   0xe LB: > { %2012 = sst [smem:[#allocation19_spill]] %s1523_s21  ;;  %s1622_s27 = sadd.s32 4294967295, %s1543_s26   ;;  %s1543_s26 = sphi %s1601_s26, %s27_s26   ;;  %s1539_s25 = sphi %s1599_s25, %s2054_s25   ;;  %s1535_s24 = sphi %s1597_s24, %s2053_s24   ;;  %s1531_s23 = sphi %s1595_s23, %s2057_s23   ;;  %s1527_s22 = sphi %s1593_s22, %s2056_s22   ;;  %s1523_s21 = sphi %s1591_s21, %s2055_s21  }
   0xf   : > { %2013 = sst [smem:[#allocation20_spill]] %s1539_s25  ;;  %s988_s28 = sadd.s32 4294967294, %s1543_s26  }
  0x10   : > { %2014 = sst [smem:[#allocation21_spill]] %s1543_s26  ;;  %p61_p0 = scmp.ne.s32.totalorder %s1527_s22, %s1523_s21 }
  0x11   : > { %p1983_p1 = scmp.eq.s32.totalorder %s1622_s27, 0  ;;  %p208_p3 = scmp.eq.s32.totalorder %s988_s28, 1 }
  0x12   : > { %p989_p5 = scmp.ge.s32.totalorder %s1543_s26, 1  ;;  %p215_p7 = scmp.lt.s32.totalorder %s1543_s26, 3 }
  0x13   : > { %p1631_p4 = por %p1983_p1, %p61_p0  ;;  %p1636_p6 = por %p208_p3, %p61_p0 }
  0x14   : > { %p1641_p8 = pnand %p989_p5, %p215_p7  ;;  %s1545_s8 = smov [#allocation8]  }
  0x15   : > { %s2015_s29 = scalar_select %p1631_p4, 1, 0 }
  0x16   : > { %s2016_s30 = scalar_select %p1636_p6, 1, 0 }
  0x17   : > { %s2018_s7 = scalar_select %p1641_p8, 1, 0 }
  0x18   : > { %2017 = sst [smem:[#allocation22_spill]] %s2016_s30  ;;  %s227_s9 = sshll.u32 %s1545_s8, 4  ;;  %s228_s9 = int_to_ptr.vmem [resolvable:$true] %s227_s9 }
  0x19   : > { %p1160_p9 = pneg %p1641_p8  ;;  %s39_s11 = sadd.s32 1, %s1539_s25 }
  0x1a   : > { %s2020_s3 = sld [smem:[#allocation27_spill]] }
  0x1b   : > { %p1650_p11 = pnand %p1160_p9, %p1983_p1 }
  0x1d   : > { %s2019_s10 = scalar_select %p1650_p11, 1, 0 }
  0x1e   : > { %p1663_p13 = pneg %p1650_p11 }
  0x20   : > { %s1275_s14 = scalar_lea.hbm %s2020_s3, 1024 }
  0x21   : > { %p1276_p12 = scmp.ne.s32.totalorder %s2020_s3, %s1275_s14  ;;  %p1282_p5 = scmp.lt.u32.totalorder %s1275_s14, %s2020_s3 }
  0x22   : > { %s2021_s17 = scalar_select %p1663_p13, 1, 0 }
  0x23   : > { %p1278_p0 = pnand %p1663_p13, %p1276_p12 }
  0x25   : > { %p1279_p3 = pneg %p1278_p0 }
  0x27   : > { %p1284_p7 = pnand %p1282_p5, %p1279_p3 }
  0x29   : > { %1287 = shalt.err (!%p1284_p7)
}
  0x2a   : > { %s1288_s20 = scalar_lea.vmem %s228_s9, 1024  ;;  %p1296_p2 = scmp.lt.s32.totalorder %s228_s9, %s228_s9 }
  0x2b   : > { %p1289_p9 = scmp.ne.s32.totalorder %s228_s9, %s1288_s20  ;;  %p1297_p6 = scmp.lt.s32.totalorder %s1288_s20, %s1288_s20 }
  0x2d   : > { %p1291_p10 = pnand %p1289_p9, %p1663_p13  ;;  %p1298_p4 = por %p1297_p6, %p1296_p2 }
  0x2f   : > { %p1292_p1 = pneg %p1291_p10 }
  0x31   : > { %p1299_p8 = pnand %p1298_p4, %p1292_p1 }
  0x33   : > { %1302 = shalt.err (!%p1299_p8)
}
  0x34   : > { %s1986_s28 = smov 64   ;;  %s1988_s8 = smov 4  }
  0x35   : > { %1163 = dma.hbm_to_vmem [thread:$0]  (!%p1650_p11), %s2020_s3, 1024, %s228_s9, [#allocation9], %s1986_s28, %s1986_s28, %s1988_s8  }
  0x36   : > { %p41_p1 = scmp.ge.s32.totalorder %s39_s11, 2  ;;  %s48_s14 = sadd.s32 1, %s1531_s23 }
  0x37   : > { %p55_p2 = scmp.ne.s32.totalorder %s1531_s23, %s1527_s22  ;;  %p56_p4 = scmp.eq.s32.totalorder %s1543_s26, 0 }
  0x38   : > { %s2059_s11 = smov (%p41_p1, %s39_s11), 0  ;;  %p2023_p8 = scmp.eq.s32.totalorder %s1622_s27, 1 }
  0x39   : > { %2022 = sst [smem:[#allocation23_spill]] %s2059_s11  ;;  %p57_p6 = por %p56_p4, %p55_p2 }
  0x3a   : > { %p1690_p10 = por %p2023_p8, %p55_p2  ;;  %s43_s16 = ssub.s32 %s1539_s25, %s2059_s11 }
  0x3b   : > { %p1187_p12 = scmp.lt.s32.totalorder %s1543_s26, 2  ;;  %p46_p0 = scmp.eq.s32.totalorder %s43_s16, 0 }
  0x3c   : > { %s2024_s15 = scalar_select %p1690_p10, 1, 0 }
  0x3d   : > { %s1990_s18 = sand.u32 1, %s1531_s23   ;;  %s1703_s19 = sshll.u32 %s1539_s25, 6 }
  0x3e   : > { %2025 = sst [smem:[#allocation24_spill]] %s2024_s15  ;;  %s1700_s9 = sshll.u32 %s1990_s18, 2 }
  0x3f   : > { %s1706_s20 = scalar_select %p46_p0, %s1531_s23, %s48_s14  }
  0x40   : > { %p1708_p3 = pnand %p1187_p12, %p57_p6  ;;  %s286_s13 = sand.u32 1, %s1543_s26  }
  0x41   : > { %2026 = sst [smem:[#allocation25_spill]] %s1706_s20  ;;  %s2028_s1 = sld [smem:[#allocation26_spill]] }
  0x42   : > { %s2027_s12 = scalar_select %p1708_p3, 1, 0 }
  0x43   : > { %s290_s18 = scalar_lea.vmem [#allocation5], %s1700_s9  ;;  %s1548_s14 = smov [#allocation10]  }
  0x44   : > { %s297_s3 = sshll.u32 %s290_s18, 4  ;;  %s1722_s11 = sshll.u32 %s1548_s14, 4  ;;  %s1720_s3 = int_to_ptr.vmem [resolvable:$true] %s297_s3  ;;  %s241_s11 = int_to_ptr.vmem [resolvable:$true] %s1722_s11 }
  0x45   : > { %s1724_s25 = scalar_lea.sflag [#allocation6], %s286_s13  ;;  %p1730_p7 = pneg %p1708_p3 }
  0x47   : > { %s1717_s16 = scalar_lea.hbm %s2028_s1, %s1703_s19  ;;  %s1308_s26 = scalar_lea.hbm %s2028_s1, 128 }
  0x48   : > { %s1303_s20 = scalar_lea.hbm %s1717_s16, 64  ;;  %p1309_p2 = scmp.lt.u32.totalorder %s1717_s16, %s2028_s1 }
  0x49   : > { %p1304_p5 = scmp.ne.s32.totalorder %s1717_s16, %s1303_s20  ;;  %p1310_p4 = scmp.lt.u32.totalorder %s1308_s26, %s1303_s20 }
  0x4a   : > { %s2029_s28 = scalar_select %p1730_p7, 1, 0 }
  0x4b   : > { %p1306_p9 = pnand %p1730_p7, %p1304_p5  ;;  %p1311_p6 = por %p1310_p4, %p1309_p2 }
  0x4c   : > { %p1312_p8 = scmp.lt.u32.totalorder %s1303_s20, %s1717_s16 }
  0x4d   : > { %p1307_p1 = pneg %p1306_p9 }
  0x4e   : > { %p1313_p12 = por %p1312_p8, %p1311_p6 }
  0x50   : > { %p1314_p0 = pnand %p1313_p12, %p1307_p1 }
  0x52   : > { %1317 = shalt.err (!%p1314_p0)
}
  0x53   : > { %s1318_s13 = scalar_lea.vmem %s1720_s3, 64  ;;  %s1549_s8 = smov [#allocation5]  }
  0x54   : > { %p1319_p5 = scmp.ne.s32.totalorder %s1720_s3, %s1318_s13  ;;  %s1323_s18 = sshll.u32 %s1549_s8, 4  ;;  %s1324_s18 = int_to_ptr.vmem [resolvable:$false] %s1323_s18 }
  0x55   : > { %s1325_s30 = scalar_lea.vmem %s1324_s18, 128  ;;  %p1326_p11 = scmp.lt.s32.totalorder %s1720_s3, %s1324_s18 }
  0x56   : > { %p1321_p9 = pnand %p1319_p5, %p1730_p7  ;;  %p1327_p13 = scmp.lt.s32.totalorder %s1325_s30, %s1318_s13 }
  0x58   : > { %p1322_p10 = pneg %p1321_p9  ;;  %p1328_p2 = por %p1327_p13, %p1326_p11 }
  0x5a   : > { %p1329_p4 = pnand %p1328_p2, %p1322_p10 }
  0x5c   : > { %1332 = shalt.err (!%p1329_p4)
}
  0x5d   : > { %1176 = dma.hbm_to_vmem [thread:$0]  (!%p1708_p3), %s1717_s16, 64, %s1720_s3, %s1724_s25  }
  0x5e   : > { %s1333_s14 = scalar_lea.hbm %s1980_s4, 1024  ;;  %p2030_p11 = scmp.ne.s32.totalorder %s2021_s17, 0 }
  0x5f   : > { %p1334_p1 = scmp.ne.s32.totalorder %s1980_s4, %s1333_s14  ;;  %p1340_p6 = scmp.lt.u32.totalorder %s1333_s14, %s1980_s4 }
  0x61   : > { %p1336_p13 = pnand %p1334_p1, %p2030_p11 }
  0x63   : > { %p1337_p10 = pneg %p1336_p13 }
  0x65   : > { %p1342_p8 = pnand %p1340_p6, %p1337_p10 }
  0x67   : > { %1345 = shalt.err (!%p1342_p8)
}
  0x68   : > { %s1346_s30 = scalar_lea.vmem %s241_s11, 1024  ;;  %p1354_p9 = scmp.lt.s32.totalorder %s241_s11, %s241_s11 }
  0x69   : > { %p1347_p12 = scmp.ne.s32.totalorder %s241_s11, %s1346_s30  ;;  %p1355_p2 = scmp.lt.s32.totalorder %s1346_s30, %s1346_s30 }
  0x6b   : > { %p1349_p0 = pnand %p1347_p12, %p2030_p11  ;;  %p1356_p4 = por %p1355_p2, %p1354_p9 }
  0x6d   : > { %p1350_p5 = pneg %p1349_p0 }
  0x6f   : > { %p1357_p3 = pnand %p1356_p4, %p1350_p5 }
  0x71   : > { %1360 = shalt.err (!%p1357_p3)
}
  0x72   : > { %p2031_p1 = scmp.ne.s32.totalorder %s2019_s10, 0  ;;  %s2032_s1 = smov 4  }
  0x73   : > { %s2033_s3 = smov 64   ;;  %s1550_s20 = smov [#allocation11]  }
  0x74   : > { %1166 = dma.hbm_to_vmem [thread:$0]  (!%p2031_p1), %s1980_s4, 1024, %s241_s11, [#allocation9], %s2033_s3, %s2033_s3, %s2032_s1  }
  0x75   : > { %s253_s14 = sshll.u32 %s1550_s20, 4  ;;  %s1361_s18 = scalar_lea.hbm %s1981_s5, 1024  ;;  %s254_s14 = int_to_ptr.vmem [resolvable:$true] %s253_s14 }
  0x76   : > { %p1362_p3 = scmp.ne.s32.totalorder %s1981_s5, %s1361_s18  ;;  %p1368_p6 = scmp.lt.u32.totalorder %s1361_s18, %s1981_s5 }
  0x78   : > { %p1364_p13 = pnand %p1362_p3, %p2030_p11 }
  0x7a   : > { %p1365_p10 = pneg %p1364_p13 }
  0x7c   : > { %p1370_p8 = pnand %p1368_p6, %p1365_p10 }
  0x7e   : > { %1373 = shalt.err (!%p1370_p8)
}
  0x7f   : > { %s1374_s11 = scalar_lea.vmem %s254_s14, 1024  ;;  %p1382_p9 = scmp.lt.s32.totalorder %s254_s14, %s254_s14 }
  0x80   : > { %p1375_p12 = scmp.ne.s32.totalorder %s254_s14, %s1374_s11  ;;  %p1383_p2 = scmp.lt.s32.totalorder %s1374_s11, %s1374_s11 }
  0x82   : > { %p1377_p0 = pnand %p1375_p12, %p2030_p11  ;;  %p1384_p4 = por %p1383_p2, %p1382_p9 }
  0x84   : > { %p1378_p5 = pneg %p1377_p0 }
  0x86   : > { %p1385_p7 = pnand %p1384_p4, %p1378_p5 }
  0x88   : > { %1388 = shalt.err (!%p1385_p7)
}
  0x89   : > { %1169 = dma.hbm_to_vmem [thread:$0]  (!%p2031_p1), %s1981_s5, 1024, %s254_s14, [#allocation12], %s2033_s3, %s2033_s3, %s2032_s1  }
  0x8a   : > { %s1801_s16 = scalar_lea.hbm %s1976_s0, %s1703_s19  ;;  %s271_s10 = scalar_lea.vmem [#allocation2], %s1700_s9 }
  0x8b   : > { %s279_s26 = sshll.u32 %s271_s10, 4  ;;  %s2034_s20 = sand.u32 1, %s1531_s23   ;;  %s280_s26 = int_to_ptr.vmem [resolvable:$true] %s279_s26 }
  0x8c   : > { %s268_s8 = scalar_lea.sflag [#allocation3], %s2034_s20  ;;  %s1389_s13 = scalar_lea.hbm %s1801_s16, 64 }
  0x8d   : > { %p1390_p7 = scmp.ne.s32.totalorder %s1801_s16, %s1389_s13  ;;  %p2035_p11 = scmp.ne.s32.totalorder %s2029_s28, 0 }
  0x8e   : > { %s1394_s14 = scalar_lea.hbm %s1976_s0, 128  ;;  %p1395_p1 = scmp.lt.u32.totalorder %s1801_s16, %s1976_s0 }
  0x8f   : > { %p1392_p3 = pnand %p1390_p7, %p2035_p11  ;;  %p1396_p10 = scmp.lt.u32.totalorder %s1394_s14, %s1389_s13 }
  0x90   : > { %p1398_p8 = scmp.lt.u32.totalorder %s1389_s13, %s1801_s16 }
  0x91   : > { %p1393_p13 = pneg %p1392_p3  ;;  %p1397_p6 = por %p1396_p10, %p1395_p1 }
  0x93   : > { %p1399_p12 = por %p1398_p8, %p1397_p6 }
  0x95   : > { %p1400_p0 = pnand %p1399_p12, %p1393_p13 }
  0x97   : > { %1403 = shalt.err (!%p1400_p0)
}
  0x98   : > { %s1404_s11 = scalar_lea.vmem %s280_s26, 64  ;;  %s1551_s6 = smov [#allocation2]  }
  0x99   : > { %p1405_p5 = scmp.ne.s32.totalorder %s280_s26, %s1404_s11  ;;  %s1409_s21 = sshll.u32 %s1551_s6, 4  ;;  %s1410_s21 = int_to_ptr.vmem [resolvable:$false] %s1409_s21 }
  0x9a   : > { %s1411_s17 = scalar_lea.vmem %s1410_s21, 128  ;;  %p1412_p4 = scmp.lt.s32.totalorder %s280_s26, %s1410_s21 }
  0x9b   : > { %p1407_p9 = pnand %p1405_p5, %p2035_p11  ;;  %p1413_p7 = scmp.lt.s32.totalorder %s1411_s17, %s1404_s11 }
  0x9d   : > { %p1408_p2 = pneg %p1407_p9  ;;  %p1414_p3 = por %p1413_p7, %p1412_p4 }
  0x9f   : > { %p1415_p1 = pnand %p1414_p3, %p1408_p2 }
  0xa1   : > { %1418 = shalt.err (!%p1415_p1)
}
  0xa2   : > { %p2036_p10 = scmp.ne.s32.totalorder %s2027_s12, 0  ;;  %s1827_s20 = scalar_lea.hbm %s1978_s2, %s1703_s19 }
  0xa3   : > { %s308_s13 = scalar_lea.vmem [#allocation7], %s1700_s9  ;;  %s1419_s3 = scalar_lea.hbm %s1827_s20, 64 }
  0xa4   : > { %1173 = dma.hbm_to_vmem [thread:$0]  (!%p2036_p10), %s1801_s16, 64, %s280_s26, %s268_s8  }
  0xa5   : > { %s315_s1 = sshll.u32 %s308_s13, 4  ;;  %p1420_p13 = scmp.ne.s32.totalorder %s1827_s20, %s1419_s3  ;;  %s316_s1 = int_to_ptr.vmem [resolvable:$true] %s315_s1 }
  0xa6   : > { %s1424_s16 = scalar_lea.hbm %s1978_s2, 128  ;;  %p1425_p12 = scmp.lt.u32.totalorder %s1827_s20, %s1978_s2 }
  0xa7   : > { %p1422_p6 = pnand %p1420_p13, %p2035_p11  ;;  %p1426_p0 = scmp.lt.u32.totalorder %s1424_s16, %s1419_s3 }
  0xa8   : > { %p1428_p9 = scmp.lt.u32.totalorder %s1419_s3, %s1827_s20 }
  0xa9   : > { %p1423_p8 = pneg %p1422_p6  ;;  %p1427_p5 = por %p1426_p0, %p1425_p12 }
  0xab   : > { %p1429_p2 = por %p1428_p9, %p1427_p5 }
  0xad   : > { %p1430_p4 = pnand %p1429_p2, %p1423_p8 }
  0xaf   : > { %1433 = shalt.err (!%p1430_p4)
}
  0xb0   : > { %s1434_s9 = scalar_lea.vmem %s316_s1, 64  ;;  %s1552_s19 = smov [#allocation7]  }
  0xb1   : > { %p1435_p7 = scmp.ne.s32.totalorder %s316_s1, %s1434_s9  ;;  %s1439_s30 = sshll.u32 %s1552_s19, 4  ;;  %s1440_s30 = int_to_ptr.vmem [resolvable:$false] %s1439_s30 }
  0xb2   : > { %s1441_s11 = scalar_lea.vmem %s1440_s30, 128  ;;  %p1442_p13 = scmp.lt.s32.totalorder %s316_s1, %s1440_s30 }
  0xb3   : > { %p1437_p3 = pnand %p1435_p7, %p2035_p11  ;;  %p1443_p6 = scmp.lt.s32.totalorder %s1441_s11, %s1434_s9 }
  0xb5   : > { %p1438_p1 = pneg %p1437_p3  ;;  %p1444_p10 = por %p1443_p6, %p1442_p13 }
  0xb7   : > { %p1445_p0 = pnand %p1444_p10, %p1438_p1 }
  0xb9   : > { %1448 = shalt.err (!%p1445_p0)
}
  0xba   : > { %p2037_p12 = scmp.ne.s32.totalorder %s2027_s12, 0  ;;  %p2038_p8 = scmp.ne.s32.totalorder %s2018_s7, 0 }
  0xbb   : > { %s1851_s28 = sand.u32 (!%p2038_p8), 1, %s1527_s22   ;;  %p2039_p11 = scmp.ne.s32.totalorder (!%p2038_p8), %s2015_s29, 0 }
  0xbc   : > { %1179 = dma.hbm_to_vmem [thread:$0]  (!%p2037_p12), %s1827_s20, 64, %s316_s1, %s1724_s25  }
  0xbd   : > { %324 = sbr.rel (%p2038_p8) target bundleno = 1217 (0x4c1), region = 44  ;;  %s1854_s6 = sshll.u32 (!%p2038_p8), %s1851_s28, 2 }
  0xbe   : > { %s327_s21 = scalar_lea.sflag (!%p2038_p8), [#allocation3], %s1851_s28  ;;  %s330_s17 = scalar_lea.vmem (!%p2038_p8), [#allocation2], %s1854_s6 }
  0xc4   : > { %1502 = dma.done.wait (%p2039_p11), %s327_s21, 64  }
  0xc5   : > { %1504 = vsyncadd (%p2039_p11), %s327_s21, 4294967232  ;;  %s335_s25 = sand.u32 1, %s1622_s27   ;;  %s339_s12 = scalar_lea.vmem [#allocation5], %s1854_s6 }
  0xc6   : > { %s336_s7 = scalar_lea.sflag [#allocation6], %s335_s25 }
  0xc7   : > { %1506 = dma.done.wait (%p2039_p11), %s336_s7, 128  }
  0xc8   : > { %1508 = vsyncadd (%p2039_p11), %s336_s7, 4294967168  ;;  %s348_s15 = scalar_lea.vmem [#allocation7], %s1854_s6  ;;  %p2040_p10 = scmp.eq.s32.totalorder %s1622_s27, 0 }
  0xca   : > { %1510 = dma.done.wait (%p2040_p10), [#allocation9], 2048   ;;  %p2041_p5 = pmov %p2040_p10 }
  0xcc   : > { %1512 = vsyncadd (%p2041_p5), [#allocation9], 4294965248  ;;  %p2042_p9 = pmov %p2041_p5 }
  0xcd   : > { %p2043_p2 = pmov %p2041_p5 }
  0xce   : > { %1514 = dma.done.wait (%p2042_p9), [#allocation12], 1024  }
  0xcf   : > { %1516 = vsyncadd (%p2043_p2), [#allocation12], 4294966272  ;;  %v1553_v0 = vmov 0.0   ;;  %vm1554_vm0 = vmmov 0   ;;  %v1247_v1 = vld [vmem:[#allocation10] sm:$0xff]   ;;  %v1249_v3 = vld [vmem:[#allocation10 + $0x8] sm:$0xff]  }
  0xd0   : > { %1088 = vmatprep.subr.bf16.mxu1 %v1553_v0  ;;  %1068 = vmatprep.subr.bf16.mxu0 %v1553_v0  ;;  %v1248_v2 = vld [vmem:[#allocation8] sm:$0xff]   ;;  %v1250_v4 = vld [vmem:[#allocation8 + $0x8] sm:$0xff]   ;;  %v1251_v5 = vld [vmem:[#allocation10 + $0x10] sm:$0xff]   ;;  %vm758_vm1 = vcmask 64512   ;;  %vm775_vm2 = vcmask 1043456   ;;  %s2044_s27 = sld [smem:[#allocation24_spill]] }
  0xd1   : > { %1104 = vmatprep.mubr.msk.bf16.mxu1 %vm1554_vm0, %v1553_v0  ;;  %1084 = vmatprep.mubr.msk.bf16.mxu0 %vm1554_vm0, %v1553_v0  ;;  %v1252_v6 = vld [vmem:[#allocation8 + $0x10] sm:$0xff]   ;;  %v1253_v7 = vld [vmem:[#allocation10 + $0x18] sm:$0xff]   ;;  %v1255_v9 = vld [vmem:[#allocation10 + $0x20] sm:$0xff]   ;;  %s1007_s29 = sshll.u32 %s1851_s28, 3  ;;  %s1034_s13 = sshll.u32 %s1535_s24, 7 }
  0xd2   : > { %1089 = vmatpush3.bf16.msra.mxu1 %v1247_v1  ;;  %1069 = vmatpush3.bf16.msra.mxu0 %v1248_v2  ;;  %v1254_v8 = vld [vmem:[#allocation8 + $0x18] sm:$0xff]   ;;  %v1256_v10 = vld [vmem:[#allocation8 + $0x20] sm:$0xff]   ;;  %v1257_v11 = vld [vmem:[#allocation10 + $0x28] sm:$0xff]   ;;  %s398_s10 = scalar_lea.vmem [#allocation13], %s1007_s29  ;;  %s2045_s14 = sld [smem:[#allocation28_spill]] }
  0xd3   : > { %1090 = vmatprep.subr.bf16.mxu1 %v1553_v0  ;;  %1070 = vmatprep.subr.bf16.mxu0 %v1553_v0  ;;  %v1258_v12 = vld [vmem:[#allocation8 + $0x28] sm:$0xff]   ;;  %v1259_v13 = vld [vmem:[#allocation10 + $0x30] sm:$0xff]   ;;  %v1261_v15 = vld [vmem:[#allocation10 + $0x38] sm:$0xff]   ;;  %s835_s20 = sshll.u32 %s398_s10, 4  ;;  %s821_s16 = scalar_lea.sflag [#allocation4], %s1851_s28  ;;  %s1924_s20 = int_to_ptr.vmem [resolvable:$true] %s835_s20 }
  0xd4   : > { %v1260_v14 = vld [vmem:[#allocation8 + $0x30] sm:$0xff]   ;;  %v1262_v16 = vld [vmem:[#allocation8 + $0x38] sm:$0xff]   ;;  %v400_v18 = vld [vmem:[%s330_s17] sm:$0xf]  ;;  %s1449_s26 = scalar_lea.vmem %s1924_s20, 128  ;;  %s1555_s24 = smov [#allocation13]  }
  0xd5   : > { %v505_v17 = vld [vmem:[%s339_s12] sm:$0xf]  ;;  %v1263_v30 = vld [vmem:[#allocation11] sm:$0xff]   ;;  %v1264_v31 = vld [vmem:[#allocation11 + $0x8] sm:$0xff]   ;;  %p1450_p4 = scmp.ne.s32.totalorder %s1924_s20, %s1449_s26  ;;  %s1453_s8 = sshll.u32 %s1555_s24, 4  ;;  %s1454_s8 = int_to_ptr.vmem [resolvable:$false] %s1453_s8 }
  0xd6   : > { %1091 = vmatpush3.bf16.msra.mxu1 %v1249_v3  ;;  %1071 = vmatpush3.bf16.msra.mxu0 %v1250_v4  ;;  %v1265_v32 = vld [vmem:[#allocation11 + $0x10] sm:$0xff]   ;;  %v1266_v33 = vld [vmem:[#allocation11 + $0x18] sm:$0xff]   ;;  %v1267_v34 = vld [vmem:[#allocation11 + $0x20] sm:$0xff]   ;;  %p2046_p7 = scmp.ne.s32.totalorder %s2044_s27, 0  ;;  %s1455_s9 = scalar_lea.vmem %s1454_s8, 256 }
  0xd7   : > { %1092 = vmatprep.subr.bf16.mxu1 %v1553_v0  ;;  %1072 = vmatprep.subr.bf16.mxu0 %v1553_v0  ;;  %v1268_v35 = vld [vmem:[#allocation11 + $0x28] sm:$0xff]   ;;  %v1269_v36 = vld [vmem:[#allocation11 + $0x30] sm:$0xff]   ;;  %v1270_v37 = vld [vmem:[#allocation11 + $0x38] sm:$0xff]   ;;  %p1456_p13 = scmp.lt.s32.totalorder %s1924_s20, %s1454_s8  ;;  %p1457_p6 = scmp.lt.s32.totalorder %s1455_s9, %s1449_s26 }
  0xd8   : > { %v610_v38 = vld [vmem:[%s348_s15] sm:$0xf]  ;;  %s1929_s18 = scalar_lea.hbm %s2045_s14, %s1034_s13  ;;  %p1451_p3 = pnand %p1450_p4, %p2046_p7 }
  0xd9   : > { %p1458_p0 = por %p1457_p6, %p1456_p13 }
  0xda   : > { %1093 = vmatpush3.bf16.msra.mxu1 %v1251_v5  ;;  %1073 = vmatpush3.bf16.msra.mxu0 %v1252_v6  ;;  %p1452_p1 = pneg %p1451_p3 }
  0xdb   : > { %1094 = vmatprep.subr.bf16.mxu1 %v1553_v0  ;;  %1074 = vmatprep.subr.bf16.mxu0 %v1553_v0 }
  0xdc   : > { %p1459_p12 = pnand %p1458_p0, %p1452_p1 }
  0xde   : > { %1095 = vmatpush3.bf16.msra.mxu1 %v1253_v7  ;;  %1075 = vmatpush3.bf16.msra.mxu0 %v1254_v8 }
  0xdf   : > { %1096 = vmatprep.subr.bf16.mxu1 %v1553_v0  ;;  %1076 = vmatprep.subr.bf16.mxu0 %v1553_v0 }
  0xe2   : > { %1097 = vmatpush3.bf16.msra.mxu1 %v1255_v9  ;;  %1077 = vmatpush3.bf16.msra.mxu0 %v1256_v10 }
  0xe3   : > { %1098 = vmatprep.subr.bf16.mxu1 %v1553_v0  ;;  %1078 = vmatprep.subr.bf16.mxu0 %v1553_v0 }
  0xe6   : > { %1099 = vmatpush3.bf16.msra.mxu1 %v1257_v11  ;;  %1079 = vmatpush3.bf16.msra.mxu0 %v1258_v12 }
  0xe7   : > { %1100 = vmatprep.subr.bf16.mxu1 %v1553_v0  ;;  %1080 = vmatprep.subr.bf16.mxu0 %v1553_v0 }
  0xea   : > { %1101 = vmatpush3.bf16.msra.mxu1 %v1259_v13  ;;  %1081 = vmatpush3.bf16.msra.mxu0 %v1260_v14 }
  0xeb   : > { %1102 = vmatprep.subr.bf16.mxu1 %v1553_v0  ;;  %1082 = vmatprep.subr.bf16.mxu0 %v1553_v0 }
  0xee   : > { %1103 = vmatpush3.bf16.msra.mxu1 %v1261_v15  ;;  %1083 = vmatpush3.bf16.msra.mxu0 %v1262_v16 }
  0xef   : > { %1128 = vmatprep.subr.bf16.mxu1 %v1553_v0  ;;  %1108 = vmatprep.subr.bf16.mxu0 %v1553_v0 }
  0xf1   : > { %1105 = vmatmul.mubr.bf16.vlgmr.msra.gmra.mrb[0].mxu1 %v505_v17  ;;  %1085 = vmatmul.mubr.bf16.vlgmr.msra.gmra.mrb[0].mxu0 %v400_v18 }
  0xf2   : > { %1130 = vmatprep.mubr.msk.bf16.mxu1 %vm1554_vm0, %v1553_v0  ;;  %1124 = vmatprep.mubr.msk.bf16.mxu0 %vm1554_vm0, %v1553_v0 }
  0xf3   : > { %1109 = vmatpush3.bf16.msra.mxu0 %v1263_v30 }
  0xf4   : > { %1110 = vmatprep.subr.bf16.mxu0 %v1553_v0 }
  0xf7   : > { %1111 = vmatpush3.bf16.msra.mxu0 %v1264_v31 }
  0xf8   : > { %1112 = vmatprep.subr.bf16.mxu0 %v1553_v0 }
  0xfb   : > { %1113 = vmatpush3.bf16.msra.mxu0 %v1265_v32 }
  0xfc   : > { %1114 = vmatprep.subr.bf16.mxu0 %v1553_v0 }
  0xff   : > { %1115 = vmatpush3.bf16.msra.mxu0 %v1266_v33 }
 0x100   : > { %1116 = vmatprep.subr.bf16.mxu0 %v1553_v0 }
 0x103   : > { %1117 = vmatpush3.bf16.msra.mxu0 %v1267_v34 }
 0x104   : > { %1118 = vmatprep.subr.bf16.mxu0 %v1553_v0 }
 0x107   : > { %1119 = vmatpush3.bf16.msra.mxu0 %v1268_v35 }
 0x108   : > { %1120 = vmatprep.subr.bf16.mxu0 %v1553_v0 }
 0x10b   : > { %1121 = vmatpush3.bf16.msra.mxu0 %v1269_v36 }
 0x10c   : > { %1122 = vmatprep.subr.bf16.mxu0 %v1553_v0 }
 0x10f   : > { %1123 = vmatpush3.bf16.msra.mxu0 %v1270_v37 }
 0x112   : > { %1125 = vmatmul.mubr.bf16.vlgmr.msra.gmra.mrb[4].mxu0 %v610_v38 }
 0x1c4   : > { %v604_v19 = vpop.f32.mrb[0].mxu1  ;;  %v499_v22 = vpop.f32.mrb[0].mxu0 }
 0x1c5   : > { %v717_v20 = vpack.c.bf16 %v604_v19, %v604_v19  ;;  %v1106_v21 = vpop.f32.mrb[1].mxu1  ;;  %v715_v24 = vmul.f32 0.17677669, %v499_v22  ;;  %v1086_v25 = vpop.f32.mrb[1].mxu0 }
 0x1c6   : > { %v607_v23 = vpop.f32.mrb[2].mxu1  ;;  %v502_v27 = vpop.f32.mrb[2].mxu0 }
 0x1c7   : > { %v1107_v26 = vpop.f32.mrb[3].mxu1  ;;  %1129 = vmatpush3.bf16.xpose.msra.mxu1 %v717_v20  ;;  %v1087_v28 = vpop.f32.mrb[3].mxu0  ;;  %v716_v29 = vpack.c.bf16 %v715_v24, %v715_v24 }
 0x1c8   : > { %1134 = vmatprep.subr.bf16.mxu1 %v1553_v0 }
 0x1ce   : > { %1131 = vmatmul.mubr.bf16.vlgmr.msra.gmra.mrb[4].mxu1 %v716_v29 }
 0x1cf   : > { %1136 = vmatprep.mubr.msk.bf16.mxu1 %vm1554_vm0, %v1553_v0 }
 0x1e5   : > { %v709_v49 = vpop.f32.mrb[4].mxu0 }
 0x1e6   : > { %v1126_v50 = vpop.f32.mrb[5].mxu0  ;;  %v771_v53 = vpack.c.bf16 %v709_v49, %v709_v49 }
 0x1e7   : > { %v712_v51 = vpop.f32.mrb[6].mxu0 }
 0x1e8   : > { %v1127_v52 = vpop.f32.mrb[7].mxu0  ;;  %v777_v54 = vsel %vm775_vm2, %v771_v53, 0 }
 0x1e9   : > { %1135 = vmatpush3.bf16.msra.mxu1 %v777_v54 }
 0x2a1   : > { %v752_v39 = vpop.f32.mrb[4].mxu1 }
 0x2a2   : > { %v1132_v40 = vpop.f32.mrb[5].mxu1  ;;  %v759_v41 = vsel %vm758_vm1, %v752_v39, -inf }
 0x2a3   : > { %760 = vmax.xlane.f32.xlu0 %v759_v41  ;;  %v755_v42 = vpop.f32.mrb[6].mxu1 }
 0x2a4   : > { %v1133_v43 = vpop.f32.mrb[7].mxu1 }
 0x330   : > { %v761_v44 = vpop.xlane.xlu0 %760 }
 0x331   : > { %v762_v45 = vsub.f32 %v752_v39, %v761_v44 }
 0x333   : > { %v763_v46 = vmul.f32 1.442695, %v762_v45 }
 0x335   : > { %1271 = vpow2.f32 %v763_v46 }
 0x33f   : > { %v1272_v47 = vpop.eup %1271 }
 0x340   : > { %v765_v48 = vsel %vm758_vm1, %v1272_v47, 0.0 }
 0x341   : > { %766 = vadd.xlane.f32.xlu0 %v765_v48 }
 0x3ce   : > { %v767_v55 = vpop.xlane.xlu0 %766 }
 0x3cf   : > { %1273 = vrcp.f32 %v767_v55 }
 0x3d9   : > { %v1274_v56 = vpop.eup %1273 }
 0x3da   : > { %v769_v57 = vmul.f32 %v1274_v56, %v1272_v47 }
 0x3dc   : > { %v770_v58 = vpack.c.bf16 %v769_v57, %v769_v57 }
 0x3de   : > { %1137 = vmatmul.mubr.msk.bf16.vlgmr.msra.gmra.mrb[8].mxu1 %vm758_vm1, %v770_v58 }
 0x4b1   : > { %v813_v59 = vpop.f32.mrb[8].mxu1 }
 0x4b2   : > { %819 = vst [vmem:[%s398_s10] sm:$0xff] %v813_v59  ;;  %v1138_v60 = vpop.f32.mrb[9].mxu1 }
 0x4b3   : > { %v816_v61 = vpop.f32.mrb[10].mxu1 }
 0x4b4   : > { %1462 = shalt.err (!%p1459_p12)
}
 0x4b5   : > { %s1463_s19 = scalar_lea.hbm %s1929_s18, 128  ;;  %s1467_s28 = scalar_lea.hbm %s2045_s14, 256 }
 0x4b6   : > { %p1464_p8 = scmp.ne.s32.totalorder %s1929_s18, %s1463_s19  ;;  %p1468_p5 = scmp.lt.u32.totalorder %s1929_s18, %s2045_s14 }
 0x4b7   : > { %p1469_p9 = scmp.lt.u32.totalorder %s1467_s28, %s1463_s19  ;;  %p1471_p4 = scmp.lt.u32.totalorder %s1463_s19, %s1929_s18 }
 0x4b8   : > { %p1465_p11 = pnand %p1464_p8, %p2046_p7 }
 0x4b9   : > { %p1470_p2 = por %p1469_p9, %p1468_p5 }
 0x4ba   : > { %p1466_p10 = pneg %p1465_p11 }
 0x4bb   : > { %p1472_p3 = por %p1471_p4, %p1470_p2 }
 0x4bd   : > { %p1473_p1 = pnand %p1472_p3, %p1466_p10 }
 0x4bf   : > { %1476 = shalt.err (!%p1473_p1)
}
 0x4c0   : > { %1158 = dma.vmem_to_hbm [thread:$0]  (%p2046_p7), %s1924_s20, 128, %s1929_s18, %s821_s16   ;;  %v1139_v62 = vpop.f32.mrb[11].mxu1 }
 0x4c1 PF: > { %s2047_s17 = sld [smem:[#allocation19_spill]]  ;;  %s2048_s25 = sld [smem:[#allocation22_spill]] }
 0x4c2   : > { %s2049_s7 = sld [smem:[#allocation21_spill]] }
 0x4c7   : > { %s847_s12 = sand.u32 1, %s2047_s17   ;;  %p2050_p13 = scmp.ne.s32.totalorder %s2048_s25, 0 }
 0x4c8   : > { %p2051_p6 = scmp.ge.s32.totalorder %s2049_s7, 2  ;;  %s848_s15 = scalar_lea.sflag [#allocation4], %s847_s12 }
 0x4ca   : > { %p1181_p0 = pnand %p2051_p6, %p2050_p13 }
 0x4cc   : > { %1518 = dma.done.wait (!%p1181_p0), %s848_s15, 128  }
 0x4cd   : > { %1520 = vsyncadd (!%p1181_p0), %s848_s15, 4294967168  ;;  %s27_s26 = sadd.s32 1, %s2049_s7   ;;  %s2052_s27 = sld [smem:[#allocation25_spill]] }
 0x4ce   : > { %p24_p12 = scmp.ge.s32.totalorder %s27_s26, 4   ;;  %s2053_s24 = sld [smem:[#allocation20_spill]] }
 0x4cf   : > { %s2054_s25 = sld [smem:[#allocation23_spill]]  ;;  %s2055_s21 = smov %s1527_s22 }
 0x4d0   : > { %s2056_s22 = smov %s1531_s23  ;;  %26 = sbr.rel (!%p24_p12) target bundleno = 14 (0xe), region = 125 }
 0x4d3   : > { %s2057_s23 = smov %s2052_s27 }
 0x4d7   :  { %853 = vsyncpa [#allocation3], 1 }
 0x4d8   :  { %855 = vsyncpa [#allocation3 + $0x1], 1 }
 0x4d9   :  { %856 = vsyncpa [#allocation6], 1 }
 0x4da   :  { %858 = vsyncpa [#allocation6 + $0x1], 1 }
 0x4db   :  { %859 = vsyncpa [#allocation9], 1 }
 0x4dc   :  { %860 = vsyncpa [#allocation12], 1 }
 0x4dd   :  { %861 = vsyncpa [#allocation4], 1 }
 0x4de   :  { %863 = vsyncpa [#allocation4 + $0x1], 1 }

</bundles_post_ra>
